<compile_context>
chip_gen: v7x
topology: tpu7x:2x2x1
jax: 0.10.0
libtpu: 0.0.40
codegen_flags: <defaults>
</compile_context>

<pallas_src>
import functools

import jax
import jax.numpy as jnp
from jax import lax
from jax.experimental import pallas as pl
from jax.experimental.pallas import tpu as pltpu


def _lstm_rnn_kernel(x_ref, wih_t_ref, whh_t_ref, b_ref, wlin_t_ref, blin_ref,
                     out_ref, *, seq_len, batch):
    """x_ref: (S*B, I); weights pre-transposed / pre-padded; out: (S*B, O_pad)."""
    H = whh_t_ref.shape[0]

    # ---- input projection for ALL timesteps in one MXU matmul ----
    gates_x = jnp.dot(x_ref[...], wih_t_ref[...],
                      preferred_element_type=jnp.float32) + b_ref[...]

    whh_t = whh_t_ref[...]           # (H, 4H)
    wlin_t = wlin_t_ref[...]         # (H, O_pad)
    blin = blin_ref[...]             # (1, O_pad)

    # Lane-constant vectors for the fused tanh-based gate activations,
    # hoisted once (constant-folded / materialized outside the loop):
    #   i,f,o lanes: sigmoid(x) = 0.5*tanh(0.5*x) + 0.5
    #   g lanes    : tanh(x)
    half = jnp.full((1, H), 0.5, jnp.float32)
    one = jnp.ones((1, H), jnp.float32)
    zero = jnp.zeros((1, H), jnp.float32)
    pre_scale = jnp.concatenate([half, half, one, half], axis=1)   # (1, 4H)
    post_mul = pre_scale                                           # (1, 4H)
    post_add = jnp.concatenate([half, half, zero, half], axis=1)   # (1, 4H)

    h = jnp.zeros((batch, H), jnp.float32)
    c = jnp.zeros((batch, H), jnp.float32)

    # ---- fully unrolled LSTM recurrence: 2 EUP pushes per step ----
    hs = []
    for t in range(seq_len):
        g = gates_x[t * batch:(t + 1) * batch, :] + jnp.dot(
            h, whh_t, preferred_element_type=jnp.float32)          # (B, 4H)
        act = jnp.tanh(g * pre_scale) * post_mul + post_add         # (B, 4H)
        i_g = act[:, 0:H]
        f_g = act[:, H:2 * H]
        g_g = act[:, 2 * H:3 * H]
        o_g = act[:, 3 * H:4 * H]
        c = f_g * c + i_g * g_g
        h = o_g * jnp.tanh(c)
        hs.append(h)

    # ---- linear head hoisted out of the recurrence: one matmul ----
    h_all = jnp.concatenate(hs, axis=0)                             # (S*B, H)
    logits = jnp.dot(h_all, wlin_t,
                     preferred_element_type=jnp.float32) + blin     # (S*B, O_pad)

    # ---- softmax over the sequence axis (legacy nn.Softmax() -> dim 0) ----
    # Static (B, O_pad) sublane slices for the per-t max/sum trees; jnp.tile
    # broadcasts back so the slab stays lane- and sublane-dense end to end.
    m = logits[0:batch, :]
    for t in range(1, seq_len):
        m = jnp.maximum(m, logits[t * batch:(t + 1) * batch, :])
    e = jnp.exp(logits - jnp.tile(m, (seq_len, 1)))                 # (S*B, O_pad)
    denom = e[0:batch, :]
    for t in range(1, seq_len):
        denom = denom + e[t * batch:(t + 1) * batch, :]
    r = pl.reciprocal(denom, approx=True)
    r = r * (2.0 - denom * r)            # one Newton step -> ~f32 accuracy

    # One dense, unmasked store of the whole (S*B, O_pad) slab.
    out_ref[...] = e * jnp.tile(r, (seq_len, 1))


@jax.jit
def lstm_rnn_forward(x, w_ih, w_hh, b_ih, b_hh, w_lin, b_lin):
    S, B, I = x.shape
    H = w_hh.shape[1]
    O = w_lin.shape[0]
    G = 4 * H
    O_PAD = pl.cdiv(O, 128) * 128                 # lane-dense head/output

    wih_t = jnp.transpose(w_ih)                   # (I, 4H)
    whh_t = jnp.transpose(w_hh)                   # (H, 4H)
    b = (b_ih + b_hh).reshape(1, G)               # (1, 4H)
    # Zero-pad the head to a lane-dense width; padded softmax columns are
    # independent and sliced off below, so values are exact.
    wlin_t = jnp.zeros((H, O_PAD), jnp.float32).at[:, :O].set(
        jnp.transpose(w_lin))                     # (H, O_pad)
    blin = jnp.zeros((1, O_PAD), jnp.float32).at[:, :O].set(
        b_lin.reshape(1, O))                      # (1, O_pad)

    x_flat = x.reshape(S * B, I)

    kernel = functools.partial(_lstm_rnn_kernel, seq_len=S, batch=B)

    flops = 2 * S * B * (I * G + H * G + H * O_PAD)
    transcendentals = S * B * (G + H) + S * B * O_PAD + B * O_PAD
    bytes_accessed = 4 * (S * B * I + I * G + H * G + G
                          + H * O_PAD + O_PAD + S * B * O_PAD)

    out2d = pl.pallas_call(
        kernel,
        out_shape=jax.ShapeDtypeStruct((S * B, O_PAD), jnp.float32),
        in_specs=[pl.BlockSpec(memory_space=pltpu.MemorySpace.VMEM)] * 6,
        out_specs=pl.BlockSpec(memory_space=pltpu.MemorySpace.VMEM),
        cost_estimate=pl.CostEstimate(flops=flops,
                                      transcendentals=transcendentals,
                                      bytes_accessed=bytes_accessed),
    )(x_flat, wih_t, whh_t, b, wlin_t, blin)

    # Slice off the padded output features and restore (S, B, O).
    return out2d[:, :O].reshape(S, B, O)


def _reference_forward(x, w_ih, w_hh, b_ih, b_hh, w_lin, b_lin):
    """Pure-JAX reference matching PyTorch LstmRNN.forward."""
    S, B, I = x.shape
    H = w_hh.shape[1]

    def cell(carry, x_t):
        h, c = carry
        g = x_t @ w_ih.T + b_ih + h @ w_hh.T + b_hh
        i_g = jax.nn.sigmoid(g[:, 0:H])
        f_g = jax.nn.sigmoid(g[:, H:2 * H])
        g_g = jnp.tanh(g[:, 2 * H:3 * H])
        o_g = jax.nn.sigmoid(g[:, 3 * H:4 * H])
        c_new = f_g * c + i_g * g_g
        h_new = o_g * jnp.tanh(c_new)
        return (h_new, c_new), h_new

    init = (jnp.zeros((B, H), jnp.float32), jnp.zeros((B, H), jnp.float32))
    _, hs = lax.scan(cell, init, x)                      # (S, B, H)
    logits = hs.reshape(S * B, H) @ w_lin.T + b_lin
    logits = logits.reshape(S, B, -1)
    return jax.nn.softmax(logits, axis=0)                # legacy dim=0


if __name__ == "__main__":
    # Small shapes consistent with the module's forward:
    #   input_size=16, hidden_size=32, output_size=110, seq=8, batch=2
    S, B, I, H, O = 8, 2, 16, 32, 110

    key = jax.random.PRNGKey(0)
    ks = jax.random.split(key, 7)
    scale = 1.0 / jnp.sqrt(jnp.float32(H))
    w_ih = jax.random.uniform(ks[0], (4 * H, I), jnp.float32, -scale, scale)
    w_hh = jax.random.uniform(ks[1], (4 * H, H), jnp.float32, -scale, scale)
    b_ih = jax.random.uniform(ks[2], (4 * H,), jnp.float32, -scale, scale)
    b_hh = jax.random.uniform(ks[3], (4 * H,), jnp.float32, -scale, scale)
    w_lin = jax.random.uniform(ks[4], (O, H), jnp.float32, -scale, scale)
    b_lin = jax.random.uniform(ks[5], (O,), jnp.float32, -scale, scale)
    x = jax.random.normal(ks[6], (S, B, I), jnp.float32)

    out = lstm_rnn_forward(x, w_ih, w_hh, b_ih, b_hh, w_lin, b_lin)
    out = jax.block_until_ready(out)

    ref = _reference_forward(x, w_ih, w_hh, b_ih, b_hh, w_lin, b_lin)
    ref = jax.block_until_ready(ref)

    assert out.shape == (S, B, O)
    assert jnp.allclose(out, ref, atol=1e-5, rtol=1e-5)
    # softmax over dim 0 -> sums along the seq axis should be 1
    assert jnp.allclose(jnp.sum(out, axis=0), 1.0, atol=1e-5)

    print("KERNEL_OK")
</pallas_src>

<mosaic_0001>
module attributes {stable_mosaic.version = 11 : i64} {
  func.func @_lstm_rnn_kernel(%arg0: memref<16x16xf32, #tpu.memory_space<vmem>>, %arg1: memref<16x128xf32, #tpu.memory_space<vmem>>, %arg2: memref<32x128xf32, #tpu.memory_space<vmem>>, %arg3: memref<1x128xf32, #tpu.memory_space<vmem>>, %arg4: memref<32x128xf32, #tpu.memory_space<vmem>>, %arg5: memref<1x128xf32, #tpu.memory_space<vmem>>, %arg6: memref<16x128xf32, #tpu.memory_space<vmem>>) attributes {dimension_semantics = [], scalar_prefetch = 0 : i64, scratch_operands = 0 : i64, tpu.core_type = #tpu.core_type<tc>} {
    %c0 = arith.constant 0 : index
    %c0_0 = arith.constant 0 : index
    %0 = vector.load %arg0[%c0, %c0_0] : memref<16x16xf32, #tpu.memory_space<vmem>>, vector<16x16xf32>
    %c0_1 = arith.constant 0 : index
    %c0_2 = arith.constant 0 : index
    %1 = vector.load %arg1[%c0_1, %c0_2] : memref<16x128xf32, #tpu.memory_space<vmem>>, vector<16x128xf32>
    %cst = arith.constant dense<0.000000e+00> : vector<16x128xf32>
    %2 = tpu.matmul %0, %1, %cst {dimension_numbers = #tpu.dot_dimension_numbers<[1], [0], [0], [1], [0, 0, 1, 1], [], []>} : vector<16x16xf32>, vector<16x128xf32>, vector<16x128xf32> -> vector<16x128xf32>
    %c0_3 = arith.constant 0 : index
    %c0_4 = arith.constant 0 : index
    %3 = vector.load %arg3[%c0_3, %c0_4] : memref<1x128xf32, #tpu.memory_space<vmem>>, vector<1x128xf32>
    %4 = vector.broadcast %3 : vector<1x128xf32> to vector<16x128xf32>
    %5 = arith.addf %2, %4 : vector<16x128xf32>
    %c0_5 = arith.constant 0 : index
    %c0_6 = arith.constant 0 : index
    %6 = vector.load %arg2[%c0_5, %c0_6] : memref<32x128xf32, #tpu.memory_space<vmem>>, vector<32x128xf32>
    %c0_7 = arith.constant 0 : index
    %c0_8 = arith.constant 0 : index
    %7 = vector.load %arg4[%c0_7, %c0_8] : memref<32x128xf32, #tpu.memory_space<vmem>>, vector<32x128xf32>
    %c0_9 = arith.constant 0 : index
    %c0_10 = arith.constant 0 : index
    %8 = vector.load %arg5[%c0_9, %c0_10] : memref<1x128xf32, #tpu.memory_space<vmem>>, vector<1x128xf32>
    %cst_11 = arith.constant 5.000000e-01 : f32
    %9 = vector.broadcast %cst_11 : f32 to vector<1x32xf32>
    %cst_12 = arith.constant 1.000000e+00 : f32
    %10 = vector.broadcast %cst_12 : f32 to vector<1x32xf32>
    %cst_13 = arith.constant 0.000000e+00 : f32
    %11 = vector.broadcast %cst_13 : f32 to vector<1x32xf32>
    %12 = tpu.concatenate %9, %9, %10, %9 in 1 : vector<1x32xf32>, vector<1x32xf32>, vector<1x32xf32>, vector<1x32xf32> -> vector<1x128xf32>
    %13 = tpu.concatenate %9, %9, %11, %9 in 1 : vector<1x32xf32>, vector<1x32xf32>, vector<1x32xf32>, vector<1x32xf32> -> vector<1x128xf32>
    %cst_14 = arith.constant 0.000000e+00 : f32
    %14 = vector.broadcast %cst_14 : f32 to vector<2x32xf32>
    %cst_15 = arith.constant 0.000000e+00 : f32
    %15 = vector.broadcast %cst_15 : f32 to vector<2x32xf32>
    %16 = vector.extract_strided_slice %5 {offsets = [0, 0], sizes = [2, 128], strides = [1, 1]} : vector<16x128xf32> to vector<2x128xf32>
    %cst_16 = arith.constant dense<0.000000e+00> : vector<2x128xf32>
    %17 = tpu.matmul %14, %6, %cst_16 {dimension_numbers = #tpu.dot_dimension_numbers<[1], [0], [0], [1], [0, 0, 1, 1], [], []>} : vector<2x32xf32>, vector<32x128xf32>, vector<2x128xf32> -> vector<2x128xf32>
    %18 = arith.addf %16, %17 : vector<2x128xf32>
    %19 = vector.broadcast %12 : vector<1x128xf32> to vector<2x128xf32>
    %20 = arith.mulf %18, %19 : vector<2x128xf32>
    %21 = math.tanh %20 : vector<2x128xf32>
    %22 = vector.broadcast %12 : vector<1x128xf32> to vector<2x128xf32>
    %23 = arith.mulf %21, %22 : vector<2x128xf32>
    %24 = vector.broadcast %13 : vector<1x128xf32> to vector<2x128xf32>
    %25 = arith.addf %23, %24 : vector<2x128xf32>
    %26 = vector.extract_strided_slice %25 {offsets = [0, 0], sizes = [2, 32], strides = [1, 1]} : vector<2x128xf32> to vector<2x32xf32>
    %27 = vector.extract_strided_slice %25 {offsets = [0, 32], sizes = [2, 32], strides = [1, 1]} : vector<2x128xf32> to vector<2x32xf32>
    %28 = vector.extract_strided_slice %25 {offsets = [0, 64], sizes = [2, 32], strides = [1, 1]} : vector<2x128xf32> to vector<2x32xf32>
    %29 = vector.extract_strided_slice %25 {offsets = [0, 96], sizes = [2, 32], strides = [1, 1]} : vector<2x128xf32> to vector<2x32xf32>
    %30 = arith.mulf %27, %15 : vector<2x32xf32>
    %31 = arith.mulf %26, %28 : vector<2x32xf32>
    %32 = arith.addf %30, %31 : vector<2x32xf32>
    %33 = math.tanh %32 : vector<2x32xf32>
    %34 = arith.mulf %29, %33 : vector<2x32xf32>
    %35 = vector.extract_strided_slice %5 {offsets = [2, 0], sizes = [2, 128], strides = [1, 1]} : vector<16x128xf32> to vector<2x128xf32>
    %cst_17 = arith.constant dense<0.000000e+00> : vector<2x128xf32>
    %36 = tpu.matmul %34, %6, %cst_17 {dimension_numbers = #tpu.dot_dimension_numbers<[1], [0], [0], [1], [0, 0, 1, 1], [], []>} : vector<2x32xf32>, vector<32x128xf32>, vector<2x128xf32> -> vector<2x128xf32>
    %37 = arith.addf %35, %36 : vector<2x128xf32>
    %38 = vector.broadcast %12 : vector<1x128xf32> to vector<2x128xf32>
    %39 = arith.mulf %37, %38 : vector<2x128xf32>
    %40 = math.tanh %39 : vector<2x128xf32>
    %41 = vector.broadcast %12 : vector<1x128xf32> to vector<2x128xf32>
    %42 = arith.mulf %40, %41 : vector<2x128xf32>
    %43 = vector.broadcast %13 : vector<1x128xf32> to vector<2x128xf32>
    %44 = arith.addf %42, %43 : vector<2x128xf32>
    %45 = vector.extract_strided_slice %44 {offsets = [0, 0], sizes = [2, 32], strides = [1, 1]} : vector<2x128xf32> to vector<2x32xf32>
    %46 = vector.extract_strided_slice %44 {offsets = [0, 32], sizes = [2, 32], strides = [1, 1]} : vector<2x128xf32> to vector<2x32xf32>
    %47 = vector.extract_strided_slice %44 {offsets = [0, 64], sizes = [2, 32], strides = [1, 1]} : vector<2x128xf32> to vector<2x32xf32>
    %48 = vector.extract_strided_slice %44 {offsets = [0, 96], sizes = [2, 32], strides = [1, 1]} : vector<2x128xf32> to vector<2x32xf32>
    %49 = arith.mulf %46, %32 : vector<2x32xf32>
    %50 = arith.mulf %45, %47 : vector<2x32xf32>
    %51 = arith.addf %49, %50 : vector<2x32xf32>
    %52 = math.tanh %51 : vector<2x32xf32>
    %53 = arith.mulf %48, %52 : vector<2x32xf32>
    %54 = vector.extract_strided_slice %5 {offsets = [4, 0], sizes = [2, 128], strides = [1, 1]} : vector<16x128xf32> to vector<2x128xf32>
    %cst_18 = arith.constant dense<0.000000e+00> : vector<2x128xf32>
    %55 = tpu.matmul %53, %6, %cst_18 {dimension_numbers = #tpu.dot_dimension_numbers<[1], [0], [0], [1], [0, 0, 1, 1], [], []>} : vector<2x32xf32>, vector<32x128xf32>, vector<2x128xf32> -> vector<2x128xf32>
    %56 = arith.addf %54, %55 : vector<2x128xf32>
    %57 = vector.broadcast %12 : vector<1x128xf32> to vector<2x128xf32>
    %58 = arith.mulf %56, %57 : vector<2x128xf32>
    %59 = math.tanh %58 : vector<2x128xf32>
    %60 = vector.broadcast %12 : vector<1x128xf32> to vector<2x128xf32>
    %61 = arith.mulf %59, %60 : vector<2x128xf32>
    %62 = vector.broadcast %13 : vector<1x128xf32> to vector<2x128xf32>
    %63 = arith.addf %61, %62 : vector<2x128xf32>
    %64 = vector.extract_strided_slice %63 {offsets = [0, 0], sizes = [2, 32], strides = [1, 1]} : vector<2x128xf32> to vector<2x32xf32>
    %65 = vector.extract_strided_slice %63 {offsets = [0, 32], sizes = [2, 32], strides = [1, 1]} : vector<2x128xf32> to vector<2x32xf32>
    %66 = vector.extract_strided_slice %63 {offsets = [0, 64], sizes = [2, 32], strides = [1, 1]} : vector<2x128xf32> to vector<2x32xf32>
    %67 = vector.extract_strided_slice %63 {offsets = [0, 96], sizes = [2, 32], strides = [1, 1]} : vector<2x128xf32> to vector<2x32xf32>
    %68 = arith.mulf %65, %51 : vector<2x32xf32>
    %69 = arith.mulf %64, %66 : vector<2x32xf32>
    %70 = arith.addf %68, %69 : vector<2x32xf32>
    %71 = math.tanh %70 : vector<2x32xf32>
    %72 = arith.mulf %67, %71 : vector<2x32xf32>
    %73 = vector.extract_strided_slice %5 {offsets = [6, 0], sizes = [2, 128], strides = [1, 1]} : vector<16x128xf32> to vector<2x128xf32>
    %cst_19 = arith.constant dense<0.000000e+00> : vector<2x128xf32>
    %74 = tpu.matmul %72, %6, %cst_19 {dimension_numbers = #tpu.dot_dimension_numbers<[1], [0], [0], [1], [0, 0, 1, 1], [], []>} : vector<2x32xf32>, vector<32x128xf32>, vector<2x128xf32> -> vector<2x128xf32>
    %75 = arith.addf %73, %74 : vector<2x128xf32>
    %76 = vector.broadcast %12 : vector<1x128xf32> to vector<2x128xf32>
    %77 = arith.mulf %75, %76 : vector<2x128xf32>
    %78 = math.tanh %77 : vector<2x128xf32>
    %79 = vector.broadcast %12 : vector<1x128xf32> to vector<2x128xf32>
    %80 = arith.mulf %78, %79 : vector<2x128xf32>
    %81 = vector.broadcast %13 : vector<1x128xf32> to vector<2x128xf32>
    %82 = arith.addf %80, %81 : vector<2x128xf32>
    %83 = vector.extract_strided_slice %82 {offsets = [0, 0], sizes = [2, 32], strides = [1, 1]} : vector<2x128xf32> to vector<2x32xf32>
    %84 = vector.extract_strided_slice %82 {offsets = [0, 32], sizes = [2, 32], strides = [1, 1]} : vector<2x128xf32> to vector<2x32xf32>
    %85 = vector.extract_strided_slice %82 {offsets = [0, 64], sizes = [2, 32], strides = [1, 1]} : vector<2x128xf32> to vector<2x32xf32>
    %86 = vector.extract_strided_slice %82 {offsets = [0, 96], sizes = [2, 32], strides = [1, 1]} : vector<2x128xf32> to vector<2x32xf32>
    %87 = arith.mulf %84, %70 : vector<2x32xf32>
    %88 = arith.mulf %83, %85 : vector<2x32xf32>
    %89 = arith.addf %87, %88 : vector<2x32xf32>
    %90 = math.tanh %89 : vector<2x32xf32>
    %91 = arith.mulf %86, %90 : vector<2x32xf32>
    %92 = vector.extract_strided_slice %5 {offsets = [8, 0], sizes = [2, 128], strides = [1, 1]} : vector<16x128xf32> to vector<2x128xf32>
    %cst_20 = arith.constant dense<0.000000e+00> : vector<2x128xf32>
    %93 = tpu.matmul %91, %6, %cst_20 {dimension_numbers = #tpu.dot_dimension_numbers<[1], [0], [0], [1], [0, 0, 1, 1], [], []>} : vector<2x32xf32>, vector<32x128xf32>, vector<2x128xf32> -> vector<2x128xf32>
    %94 = arith.addf %92, %93 : vector<2x128xf32>
    %95 = vector.broadcast %12 : vector<1x128xf32> to vector<2x128xf32>
    %96 = arith.mulf %94, %95 : vector<2x128xf32>
    %97 = math.tanh %96 : vector<2x128xf32>
    %98 = vector.broadcast %12 : vector<1x128xf32> to vector<2x128xf32>
    %99 = arith.mulf %97, %98 : vector<2x128xf32>
    %100 = vector.broadcast %13 : vector<1x128xf32> to vector<2x128xf32>
    %101 = arith.addf %99, %100 : vector<2x128xf32>
    %102 = vector.extract_strided_slice %101 {offsets = [0, 0], sizes = [2, 32], strides = [1, 1]} : vector<2x128xf32> to vector<2x32xf32>
    %103 = vector.extract_strided_slice %101 {offsets = [0, 32], sizes = [2, 32], strides = [1, 1]} : vector<2x128xf32> to vector<2x32xf32>
    %104 = vector.extract_strided_slice %101 {offsets = [0, 64], sizes = [2, 32], strides = [1, 1]} : vector<2x128xf32> to vector<2x32xf32>
    %105 = vector.extract_strided_slice %101 {offsets = [0, 96], sizes = [2, 32], strides = [1, 1]} : vector<2x128xf32> to vector<2x32xf32>
    %106 = arith.mulf %103, %89 : vector<2x32xf32>
    %107 = arith.mulf %102, %104 : vector<2x32xf32>
    %108 = arith.addf %106, %107 : vector<2x32xf32>
    %109 = math.tanh %108 : vector<2x32xf32>
    %110 = arith.mulf %105, %109 : vector<2x32xf32>
    %111 = vector.extract_strided_slice %5 {offsets = [10, 0], sizes = [2, 128], strides = [1, 1]} : vector<16x128xf32> to vector<2x128xf32>
    %cst_21 = arith.constant dense<0.000000e+00> : vector<2x128xf32>
    %112 = tpu.matmul %110, %6, %cst_21 {dimension_numbers = #tpu.dot_dimension_numbers<[1], [0], [0], [1], [0, 0, 1, 1], [], []>} : vector<2x32xf32>, vector<32x128xf32>, vector<2x128xf32> -> vector<2x128xf32>
    %113 = arith.addf %111, %112 : vector<2x128xf32>
    %114 = vector.broadcast %12 : vector<1x128xf32> to vector<2x128xf32>
    %115 = arith.mulf %113, %114 : vector<2x128xf32>
    %116 = math.tanh %115 : vector<2x128xf32>
    %117 = vector.broadcast %12 : vector<1x128xf32> to vector<2x128xf32>
    %118 = arith.mulf %116, %117 : vector<2x128xf32>
    %119 = vector.broadcast %13 : vector<1x128xf32> to vector<2x128xf32>
    %120 = arith.addf %118, %119 : vector<2x128xf32>
    %121 = vector.extract_strided_slice %120 {offsets = [0, 0], sizes = [2, 32], strides = [1, 1]} : vector<2x128xf32> to vector<2x32xf32>
    %122 = vector.extract_strided_slice %120 {offsets = [0, 32], sizes = [2, 32], strides = [1, 1]} : vector<2x128xf32> to vector<2x32xf32>
    %123 = vector.extract_strided_slice %120 {offsets = [0, 64], sizes = [2, 32], strides = [1, 1]} : vector<2x128xf32> to vector<2x32xf32>
    %124 = vector.extract_strided_slice %120 {offsets = [0, 96], sizes = [2, 32], strides = [1, 1]} : vector<2x128xf32> to vector<2x32xf32>
    %125 = arith.mulf %122, %108 : vector<2x32xf32>
    %126 = arith.mulf %121, %123 : vector<2x32xf32>
    %127 = arith.addf %125, %126 : vector<2x32xf32>
    %128 = math.tanh %127 : vector<2x32xf32>
    %129 = arith.mulf %124, %128 : vector<2x32xf32>
    %130 = vector.extract_strided_slice %5 {offsets = [12, 0], sizes = [2, 128], strides = [1, 1]} : vector<16x128xf32> to vector<2x128xf32>
    %cst_22 = arith.constant dense<0.000000e+00> : vector<2x128xf32>
    %131 = tpu.matmul %129, %6, %cst_22 {dimension_numbers = #tpu.dot_dimension_numbers<[1], [0], [0], [1], [0, 0, 1, 1], [], []>} : vector<2x32xf32>, vector<32x128xf32>, vector<2x128xf32> -> vector<2x128xf32>
    %132 = arith.addf %130, %131 : vector<2x128xf32>
    %133 = vector.broadcast %12 : vector<1x128xf32> to vector<2x128xf32>
    %134 = arith.mulf %132, %133 : vector<2x128xf32>
    %135 = math.tanh %134 : vector<2x128xf32>
    %136 = vector.broadcast %12 : vector<1x128xf32> to vector<2x128xf32>
    %137 = arith.mulf %135, %136 : vector<2x128xf32>
    %138 = vector.broadcast %13 : vector<1x128xf32> to vector<2x128xf32>
    %139 = arith.addf %137, %138 : vector<2x128xf32>
    %140 = vector.extract_strided_slice %139 {offsets = [0, 0], sizes = [2, 32], strides = [1, 1]} : vector<2x128xf32> to vector<2x32xf32>
    %141 = vector.extract_strided_slice %139 {offsets = [0, 32], sizes = [2, 32], strides = [1, 1]} : vector<2x128xf32> to vector<2x32xf32>
    %142 = vector.extract_strided_slice %139 {offsets = [0, 64], sizes = [2, 32], strides = [1, 1]} : vector<2x128xf32> to vector<2x32xf32>
    %143 = vector.extract_strided_slice %139 {offsets = [0, 96], sizes = [2, 32], strides = [1, 1]} : vector<2x128xf32> to vector<2x32xf32>
    %144 = arith.mulf %141, %127 : vector<2x32xf32>
    %145 = arith.mulf %140, %142 : vector<2x32xf32>
    %146 = arith.addf %144, %145 : vector<2x32xf32>
    %147 = math.tanh %146 : vector<2x32xf32>
    %148 = arith.mulf %143, %147 : vector<2x32xf32>
    %149 = vector.extract_strided_slice %5 {offsets = [14, 0], sizes = [2, 128], strides = [1, 1]} : vector<16x128xf32> to vector<2x128xf32>
    %cst_23 = arith.constant dense<0.000000e+00> : vector<2x128xf32>
    %150 = tpu.matmul %148, %6, %cst_23 {dimension_numbers = #tpu.dot_dimension_numbers<[1], [0], [0], [1], [0, 0, 1, 1], [], []>} : vector<2x32xf32>, vector<32x128xf32>, vector<2x128xf32> -> vector<2x128xf32>
    %151 = arith.addf %149, %150 : vector<2x128xf32>
    %152 = vector.broadcast %12 : vector<1x128xf32> to vector<2x128xf32>
    %153 = arith.mulf %151, %152 : vector<2x128xf32>
    %154 = math.tanh %153 : vector<2x128xf32>
    %155 = vector.broadcast %12 : vector<1x128xf32> to vector<2x128xf32>
    %156 = arith.mulf %154, %155 : vector<2x128xf32>
    %157 = vector.broadcast %13 : vector<1x128xf32> to vector<2x128xf32>
    %158 = arith.addf %156, %157 : vector<2x128xf32>
    %159 = vector.extract_strided_slice %158 {offsets = [0, 0], sizes = [2, 32], strides = [1, 1]} : vector<2x128xf32> to vector<2x32xf32>
    %160 = vector.extract_strided_slice %158 {offsets = [0, 32], sizes = [2, 32], strides = [1, 1]} : vector<2x128xf32> to vector<2x32xf32>
    %161 = vector.extract_strided_slice %158 {offsets = [0, 64], sizes = [2, 32], strides = [1, 1]} : vector<2x128xf32> to vector<2x32xf32>
    %162 = vector.extract_strided_slice %158 {offsets = [0, 96], sizes = [2, 32], strides = [1, 1]} : vector<2x128xf32> to vector<2x32xf32>
    %163 = arith.mulf %160, %146 : vector<2x32xf32>
    %164 = arith.mulf %159, %161 : vector<2x32xf32>
    %165 = arith.addf %163, %164 : vector<2x32xf32>
    %166 = math.tanh %165 : vector<2x32xf32>
    %167 = arith.mulf %162, %166 : vector<2x32xf32>
    %168 = tpu.concatenate %34, %53, %72, %91, %110, %129, %148, %167 in 0 : vector<2x32xf32>, vector<2x32xf32>, vector<2x32xf32>, vector<2x32xf32>, vector<2x32xf32>, vector<2x32xf32>, vector<2x32xf32>, vector<2x32xf32> -> vector<16x32xf32>
    %cst_24 = arith.constant dense<0.000000e+00> : vector<16x128xf32>
    %169 = tpu.matmul %168, %7, %cst_24 {dimension_numbers = #tpu.dot_dimension_numbers<[1], [0], [0], [1], [0, 0, 1, 1], [], []>} : vector<16x32xf32>, vector<32x128xf32>, vector<16x128xf32> -> vector<16x128xf32>
    %170 = vector.broadcast %8 : vector<1x128xf32> to vector<16x128xf32>
    %171 = arith.addf %169, %170 : vector<16x128xf32>
    %172 = vector.extract_strided_slice %171 {offsets = [0, 0], sizes = [2, 128], strides = [1, 1]} : vector<16x128xf32> to vector<2x128xf32>
    %173 = vector.extract_strided_slice %171 {offsets = [2, 0], sizes = [2, 128], strides = [1, 1]} : vector<16x128xf32> to vector<2x128xf32>
    %174 = arith.maximumf %172, %173 : vector<2x128xf32>
    %175 = vector.extract_strided_slice %171 {offsets = [4, 0], sizes = [2, 128], strides = [1, 1]} : vector<16x128xf32> to vector<2x128xf32>
    %176 = arith.maximumf %174, %175 : vector<2x128xf32>
    %177 = vector.extract_strided_slice %171 {offsets = [6, 0], sizes = [2, 128], strides = [1, 1]} : vector<16x128xf32> to vector<2x128xf32>
    %178 = arith.maximumf %176, %177 : vector<2x128xf32>
    %179 = vector.extract_strided_slice %171 {offsets = [8, 0], sizes = [2, 128], strides = [1, 1]} : vector<16x128xf32> to vector<2x128xf32>
    %180 = arith.maximumf %178, %179 : vector<2x128xf32>
    %181 = vector.extract_strided_slice %171 {offsets = [10, 0], sizes = [2, 128], strides = [1, 1]} : vector<16x128xf32> to vector<2x128xf32>
    %182 = arith.maximumf %180, %181 : vector<2x128xf32>
    %183 = vector.extract_strided_slice %171 {offsets = [12, 0], sizes = [2, 128], strides = [1, 1]} : vector<16x128xf32> to vector<2x128xf32>
    %184 = arith.maximumf %182, %183 : vector<2x128xf32>
    %185 = vector.extract_strided_slice %171 {offsets = [14, 0], sizes = [2, 128], strides = [1, 1]} : vector<16x128xf32> to vector<2x128xf32>
    %186 = arith.maximumf %184, %185 : vector<2x128xf32>
    %187 = tpu.concatenate %186, %186, %186, %186, %186, %186, %186, %186 in 0 : vector<2x128xf32>, vector<2x128xf32>, vector<2x128xf32>, vector<2x128xf32>, vector<2x128xf32>, vector<2x128xf32>, vector<2x128xf32>, vector<2x128xf32> -> vector<16x128xf32>
    %188 = arith.subf %171, %187 : vector<16x128xf32>
    %189 = math.exp %188 : vector<16x128xf32>
    %190 = vector.extract_strided_slice %189 {offsets = [0, 0], sizes = [2, 128], strides = [1, 1]} : vector<16x128xf32> to vector<2x128xf32>
    %191 = vector.extract_strided_slice %189 {offsets = [2, 0], sizes = [2, 128], strides = [1, 1]} : vector<16x128xf32> to vector<2x128xf32>
    %192 = arith.addf %190, %191 : vector<2x128xf32>
    %193 = vector.extract_strided_slice %189 {offsets = [4, 0], sizes = [2, 128], strides = [1, 1]} : vector<16x128xf32> to vector<2x128xf32>
    %194 = arith.addf %192, %193 : vector<2x128xf32>
    %195 = vector.extract_strided_slice %189 {offsets = [6, 0], sizes = [2, 128], strides = [1, 1]} : vector<16x128xf32> to vector<2x128xf32>
    %196 = arith.addf %194, %195 : vector<2x128xf32>
    %197 = vector.extract_strided_slice %189 {offsets = [8, 0], sizes = [2, 128], strides = [1, 1]} : vector<16x128xf32> to vector<2x128xf32>
    %198 = arith.addf %196, %197 : vector<2x128xf32>
    %199 = vector.extract_strided_slice %189 {offsets = [10, 0], sizes = [2, 128], strides = [1, 1]} : vector<16x128xf32> to vector<2x128xf32>
    %200 = arith.addf %198, %199 : vector<2x128xf32>
    %201 = vector.extract_strided_slice %189 {offsets = [12, 0], sizes = [2, 128], strides = [1, 1]} : vector<16x128xf32> to vector<2x128xf32>
    %202 = arith.addf %200, %201 : vector<2x128xf32>
    %203 = vector.extract_strided_slice %189 {offsets = [14, 0], sizes = [2, 128], strides = [1, 1]} : vector<16x128xf32> to vector<2x128xf32>
    %204 = arith.addf %202, %203 : vector<2x128xf32>
    %205 = tpu.reciprocal %204 {approx = true} : vector<2x128xf32> -> vector<2x128xf32>
    %206 = arith.mulf %204, %205 : vector<2x128xf32>
    %cst_25 = arith.constant 2.000000e+00 : f32
    %207 = vector.broadcast %cst_25 : f32 to vector<2x128xf32>
    %208 = arith.subf %207, %206 : vector<2x128xf32>
    %209 = arith.mulf %205, %208 : vector<2x128xf32>
    %210 = tpu.concatenate %209, %209, %209, %209, %209, %209, %209, %209 in 0 : vector<2x128xf32>, vector<2x128xf32>, vector<2x128xf32>, vector<2x128xf32>, vector<2x128xf32>, vector<2x128xf32>, vector<2x128xf32>, vector<2x128xf32> -> vector<16x128xf32>
    %211 = arith.mulf %189, %210 : vector<16x128xf32>
    %c0_26 = arith.constant 0 : index
    %c0_27 = arith.constant 0 : index
    %212 = vector.load %arg6[%c0_26, %c0_27] : memref<16x128xf32, #tpu.memory_space<vmem>>, vector<16x128xf32>
    tpu.vector_store %arg6[%c0_26, %c0_27], %211 {strides = array<i32>} : memref<16x128xf32, #tpu.memory_space<vmem>>, vector<16x128xf32>,
    return
  }
}

</mosaic_0001>

<bundles_post_ra>
// kernel: lstm_rnn_forward.1
= control target key start
LH: loop header
LB: loop body
LE: loop exit
PB: predicated region body
PF: predicated region fallthrough
CT: control target
= control target key end

     0   :  { %vm35_vm0 = vcmask 130048   ;;  %v1451_v3 = vmov 0.0|0.0   ;;  %vm1452_vm1 = vmmov 0   ;;  %v1453_v10 = vmov 0.0   ;;  %s1708_s0 = inlined_call_operand.vmem [shape: f32[16,16], index: 0, kind: input, shape index: {}]   ;;  %s1709_s1 = inlined_call_operand.vmem [shape: f32[16,128], index: 1, kind: input, shape index: {}]   ;;  %s1710_s2 = inlined_call_operand.vmem [shape: f32[32,128], index: 2, kind: input, shape index: {}]   ;;  %s1711_s3 = inlined_call_operand.vmem [shape: f32[1,128], index: 3, kind: input, shape index: {}]   ;;  %s1712_s4 = inlined_call_operand.vmem [shape: f32[32,128], index: 4, kind: input, shape index: {}]   ;;  %s1713_s5 = inlined_call_operand.vmem [shape: f32[1,128], index: 5, kind: input, shape index: {}]   ;;  %s1714_s6 = inlined_call_operand.hbm [shape: f32[16,128], index: 6, kind: output, shape index: {}]  }
   0x1   :  { %v26_v0 = vld [vmem:[%s1709_s1] sm:$0xff]  ;;  %v27_v1 = vld [vmem:[%s1709_s1 + $0x8] sm:$0xff]  ;;  %1324 = vmatprep.subr.bf16.mxu1 %v1451_v3  ;;  %v119_v8 = vld [vmem:[%s1710_s2 + $0x10] sm:$0xff]  ;;  %1229 = vmatprep.mubr.msk.f32.mxu1 %vm1452_vm1, %v1453_v10 }
   0x2   :  { %v117_v2 = vld [vmem:[%s1710_s2] sm:$0xff]  ;;  %v1320_v4 = vpack.c.bf16 %v27_v1, %v26_v0  ;;  %v118_v5 = vld [vmem:[%s1710_s2 + $0x8] sm:$0xff]  ;;  %v120_v9 = vld [vmem:[%s1710_s2 + $0x18] sm:$0xff] }
   0x3   :  { %v24_v6 = vld [vmem:[%s1708_s0] sm:$0xff]  ;;  %v1511_v7 = vpack.c.bf16 %v118_v5, %v117_v2 }
   0x4   :  { %1218 = vmatprep.mubr.msk.f32.mxu0 %vm35_vm0, %v24_v6 }
   0x5   :  { %11 = vsyncpa [#allocation3], 0  ;;  %1321 = vmatprep.subr.bf16.mxu0 %v1320_v4  ;;  %1326 = vmatpush3.bf16.msra.mxu1 %v1511_v7  ;;  %v25_v11 = vld [vmem:[%s1708_s0 + $0x8] sm:$0xff]  ;;  %v1526_v12 = vpack.c.bf16 %v120_v9, %v119_v8  ;;  %v207_v13 = vlaneseq  ;;  %vm126_vm2 = vcmask 523264   ;;  %v1454_v15 = vmov 1.0   ;;  %s1456_s12 = smov 32  }
   0x6   :  { %1323 = vmatpush3.bf16.msra.mxu0 %v1320_v4  ;;  %1327 = vmatprep.subr.bf16.mxu1 %v1451_v3  ;;  %v127_v16 = vsel %vm126_vm2, 0.5, %v1454_v15  ;;  %vm128_vm3 = vcmask 785408   ;;  %v1151_v17 = vld [vmem:[%s1711_s3] ss:$0 sm:$0xff]  ;;  %v130_v29 = vsel %vm126_vm2, 0.5, %v1453_v10  ;;  %s1455_s3 = smov 64  }
   0x7   :  { %1330 = vmatprep.subr.bf16.mxu0 %v1451_v3  ;;  %v208_v14 = vshrl.u32 %v207_v13, 7  ;;  %v129_v20 = vsel %vm128_vm3, %v127_v16, 0.5  ;;  %v131_v30 = vsel %vm128_vm3, %v130_v29, 0.5  ;;  %vm132_vm4 = vcmask 261120  }
   0x8   :  { %vm959_vm5 = vcmask 1041408   ;;  %vm961_vm6 = vcmask 1043456   ;;  %vm963_vm7 = vcmask 1045504  }
   0x9   :  { %1219 = vmatmul.mubr.msk.f32.vlgmr.msra.gmra.mrb[0].mxu0 %vm35_vm0, %v25_v11  ;;  %1329 = vmatpush3.bf16.msra.mxu1 %v1526_v12  ;;  %v209_v18 = vsub.s32 0, %v208_v14 }
   0xa   :  { %1332 = vmatpush3.bf16.msra.mxu0 %v1511_v7  ;;  %1240 = vmatprep.mubr.msk.f32.mxu0 %vm1452_vm1, %v1453_v10 }
   0xb   :  { %1333 = vmatprep.subr.bf16.mxu0 %v1451_v3  ;;  %1336 = vmatprep.subr.bf16.mxu1 %v1451_v3  ;;  %v1554_v24 = vrot.slane %v129_v20, %v209_v18  ;;  %v1560_v31 = vrot.slane %v131_v30, %v209_v18 }
   0xc   :  { %1230 = vmatmul.mubr.f32.vlgmr.msra.gmra.mrb[0].mxu1 %v1453_v10 }
   0xd   :  { %1338 = vmatpush3.bf16.msra.mxu1 %v1511_v7  ;;  %1251 = vmatprep.mubr.msk.f32.mxu1 %vm1452_vm1, %v1453_v10 }
   0xe   :  { %1335 = vmatpush3.bf16.msra.mxu0 %v1526_v12  ;;  %1339 = vmatprep.subr.bf16.mxu1 %v1451_v3 }
   0xf   :  { %1342 = vmatprep.subr.bf16.mxu0 %v1451_v3 }
  0x11   :  { %1341 = vmatpush3.bf16.msra.mxu1 %v1526_v12 }
  0x12   :  { %1348 = vmatprep.subr.bf16.mxu1 %v1451_v3 }
  0xdc   :  { %v1220_v19 = vpop.f32.mrb[0].mxu0 }
  0xdd   :  { %v1550_v21 = vadd.f32 %v1220_v19, %v1151_v17  ;;  %v108_v22 = vpop.f32.mrb[1].mxu0 }
  0xde   :  { %v1552_v23 = vadd.f32 %v1151_v17, %v108_v22 }
  0xdf   :  { %v202_v25 = vpop.f32.mrb[0].mxu1 }
  0xe0   :  { %v206_v26 = vadd.f32 %v202_v25, %v1552_v23  ;;  %v1231_v27 = vpop.f32.mrb[1].mxu1 }
  0xe2   :  { %v211_v28 = vmul.f32 %v1554_v24, %v206_v26 }
  0xe4   :  { %1389 = vtanh.f32 %v211_v28 }
  0xee   :  { %v1390_v32 = vpop.eup %1389 }
  0xef   :  { %v213_v33 = vmul.f32 %v1390_v32, %v1554_v24 }
  0xf1   :  { %v218_v34 = vadd.f32 %v1560_v31, %v213_v33 }
  0xf3   :  { %221 = vrot.lane.b32.xlu0 %v218_v34, %s1455_s3  ;;  %v219_v37 = vmul.f32 0.0, %v218_v34 }
 0x165   :  { %v222_v35 = vpop.permute.xlu0 %221 }
 0x166   :  { %v224_v36 = vmul.f32 %v222_v35, %v218_v34 }
 0x168   :  { %226 = vrot.lane.b32.xlu0 %v224_v36, %s1456_s12 }
 0x1da   :  { %v227_v38 = vpop.permute.xlu0 %226 }
 0x1db   :  { %v229_v39 = vadd.f32 %v227_v38, %v219_v37 }
 0x1dd   :  { %1391 = vtanh.f32 %v229_v39  ;;  %v320_v54 = vrot.slane %v229_v39, 6 }
 0x1e7   :  { %v1392_v40 = vpop.eup %1391 }
 0x1e8   :  { %232 = vrot.lane.b32.xlu1 %v1392_v40, %s1455_s3 }
 0x25a   :  { %v233_v41 = vpop.permute.xlu1 %232 }
 0x25b   :  { %v1567_v42 = vmul.f32 %v233_v41, %v218_v34 }
 0x25d   :  { %237 = vrot.lane.b32.xlu1 %v1567_v42, %s1456_s12 }
 0x2cf   :  { %v238_v43 = vpop.permute.xlu1 %237 }
 0x2d0   :  { %1241 = vmatmul.mubr.msk.f32.vlgmr.msra.gmra.mrb[2].mxu0 %vm132_vm4, %v238_v43 }
 0x2d1   :  { %1344 = vmatpush3.bf16.msra.mxu0 %v1511_v7  ;;  %1262 = vmatprep.mubr.msk.f32.mxu0 %vm1452_vm1, %v1453_v10 }
 0x2d2   :  { %1345 = vmatprep.subr.bf16.mxu0 %v1451_v3 }
 0x2d5   :  { %1347 = vmatpush3.bf16.msra.mxu0 %v1526_v12 }
 0x2d6   :  { %1354 = vmatprep.subr.bf16.mxu0 %v1451_v3 }
 0x3a3   :  { %v307_v44 = vpop.f32.mrb[2].mxu0 }
 0x3a4   :  { %v312_v45 = vrot.slane %v307_v44, 6  ;;  %v1242_v46 = vpop.f32.mrb[3].mxu0 }
 0x3a6   :  { %v314_v47 = vadd.f32 %v312_v45, %v1552_v23 }
 0x3a8   :  { %v315_v48 = vmul.f32 %v314_v47, %v1554_v24 }
 0x3aa   :  { %1393 = vtanh.f32 %v315_v48 }
 0x3b4   :  { %v1394_v49 = vpop.eup %1393 }
 0x3b5   :  { %v317_v50 = vmul.f32 %v1394_v49, %v1554_v24 }
 0x3b7   :  { %v318_v51 = vadd.f32 %v317_v50, %v1560_v31 }
 0x3b9   :  { %324 = vrot.lane.b32.xlu0 %v318_v51, %s1455_s3  ;;  %v322_v55 = vmul.f32 %v320_v54, %v318_v51 }
 0x42b   :  { %v325_v52 = vpop.permute.xlu0 %324 }
 0x42c   :  { %v327_v53 = vmul.f32 %v325_v52, %v318_v51 }
 0x42e   :  { %329 = vrot.lane.b32.xlu1 %v327_v53, %s1456_s12 }
 0x4a0   :  { %v330_v56 = vpop.permute.xlu1 %329 }
 0x4a1   :  { %v332_v57 = vadd.f32 %v330_v56, %v322_v55 }
 0x4a3   :  { %1395 = vtanh.f32 %v332_v57  ;;  %v424_v13 = vrot.slane %v332_v57, 6 }
 0x4ad   :  { %v1396_v58 = vpop.eup %1395 }
 0x4ae   :  { %335 = vrot.lane.b32.xlu0 %v1396_v58, %s1455_s3 }
 0x520   :  { %v336_v59 = vpop.permute.xlu0 %335 }
 0x521   :  { %v338_v60 = vmul.f32 %v336_v59, %v318_v51 }
 0x523   :  { %v340_v61 = vrot.slane %v338_v60, 2  ;;  %v960_v20 = vsel %vm959_vm5, %v1567_v42, %v338_v60 }
 0x525   :  { %341 = vrot.lane.b32.xlu1 %v340_v61, %s1456_s12 }
 0x597   :  { %v342_v62 = vpop.permute.xlu1 %341 }
 0x598   :  { %1252 = vmatmul.mubr.msk.f32.vlgmr.msra.gmra.mrb[2].mxu1 %vm132_vm4, %v342_v62 }
 0x599   :  { %1350 = vmatpush3.bf16.msra.mxu1 %v1511_v7  ;;  %1273 = vmatprep.mubr.msk.f32.mxu1 %vm1452_vm1, %v1453_v10 }
 0x59a   :  { %1351 = vmatprep.subr.bf16.mxu1 %v1451_v3 }
 0x59d   :  { %1353 = vmatpush3.bf16.msra.mxu1 %v1526_v12 }
 0x59e   :  { %1360 = vmatprep.subr.bf16.mxu1 %v1451_v3 }
 0x66b   :  { %v411_v63 = vpop.f32.mrb[2].mxu1 }
 0x66c   :  { %v416_v0 = vrot.slane %v411_v63, 4  ;;  %v1253_v1 = vpop.f32.mrb[3].mxu1 }
 0x66e   :  { %v418_v2 = vadd.f32 %v416_v0, %v1552_v23 }
 0x670   :  { %v419_v4 = vmul.f32 %v418_v2, %v1554_v24 }
 0x672   :  { %1397 = vtanh.f32 %v419_v4 }
 0x67c   :  { %v1398_v5 = vpop.eup %1397 }
 0x67d   :  { %v421_v6 = vmul.f32 %v1398_v5, %v1554_v24 }
 0x67f   :  { %v422_v8 = vadd.f32 %v421_v6, %v1560_v31 }
 0x681   :  { %428 = vrot.lane.b32.xlu0 %v422_v8, %s1455_s3  ;;  %v426_v14 = vmul.f32 %v424_v13, %v422_v8 }
 0x6f3   :  { %v429_v9 = vpop.permute.xlu0 %428 }
 0x6f4   :  { %v431_v11 = vmul.f32 %v429_v9, %v422_v8 }
 0x6f6   :  { %433 = vrot.lane.b32.xlu1 %v431_v11, %s1456_s12 }
 0x768   :  { %v434_v15 = vpop.permute.xlu1 %433 }
 0x769   :  { %v436_v16 = vadd.f32 %v434_v15, %v426_v14 }
 0x76b   :  { %1399 = vtanh.f32 %v436_v16  ;;  %v528_v38 = vrot.slane %v436_v16, 6 }
 0x775   :  { %v1400_v17 = vpop.eup %1399 }
 0x776   :  { %439 = vrot.lane.b32.xlu0 %v1400_v17, %s1455_s3 }
 0x7e8   :  { %v440_v18 = vpop.permute.xlu0 %439 }
 0x7e9   :  { %v442_v19 = vmul.f32 %v440_v18, %v422_v8 }
 0x7eb   :  { %v444_v22 = vrot.slane %v442_v19, 4  ;;  %v962_v25 = vsel %vm961_vm6, %v960_v20, %v442_v19 }
 0x7ed   :  { %445 = vrot.lane.b32.xlu1 %v444_v22, %s1456_s12 }
 0x85f   :  { %v446_v26 = vpop.permute.xlu1 %445 }
 0x860   :  { %1263 = vmatmul.mubr.msk.f32.vlgmr.msra.gmra.mrb[4].mxu0 %vm132_vm4, %v446_v26 }
 0x861   :  { %1356 = vmatpush3.bf16.msra.mxu0 %v1511_v7  ;;  %1284 = vmatprep.mubr.msk.f32.mxu0 %vm1452_vm1, %v1453_v10 }
 0x862   :  { %1357 = vmatprep.subr.bf16.mxu0 %v1451_v3 }
 0x865   :  { %1359 = vmatpush3.bf16.msra.mxu0 %v1526_v12 }
 0x866   :  { %1366 = vmatprep.subr.bf16.mxu0 %v1451_v3 }
 0x933   :  { %v515_v27 = vpop.f32.mrb[4].mxu0 }
 0x934   :  { %v520_v28 = vrot.slane %v515_v27, 2  ;;  %v1264_v29 = vpop.f32.mrb[5].mxu0 }
 0x936   :  { %v522_v30 = vadd.f32 %v520_v28, %v1552_v23 }
 0x938   :  { %v523_v32 = vmul.f32 %v522_v30, %v1554_v24 }
 0x93a   :  { %1401 = vtanh.f32 %v523_v32 }
 0x944   :  { %v1402_v33 = vpop.eup %1401 }
 0x945   :  { %v525_v34 = vmul.f32 %v1402_v33, %v1554_v24 }
 0x947   :  { %v526_v35 = vadd.f32 %v525_v34, %v1560_v31 }
 0x949   :  { %532 = vrot.lane.b32.xlu0 %v526_v35, %s1455_s3  ;;  %v530_v39 = vmul.f32 %v528_v38, %v526_v35 }
 0x9bb   :  { %v533_v36 = vpop.permute.xlu0 %532 }
 0x9bc   :  { %v535_v37 = vmul.f32 %v533_v36, %v526_v35 }
 0x9be   :  { %537 = vrot.lane.b32.xlu1 %v535_v37, %s1456_s12 }
 0xa30   :  { %v538_v40 = vpop.permute.xlu1 %537 }
 0xa31   :  { %v540_v41 = vadd.f32 %v538_v40, %v530_v39 }
 0xa33   :  { %1403 = vtanh.f32 %v540_v41  ;;  %v629_v56 = vrot.slane %v540_v41, 6 }
 0xa3d   :  { %v1404_v23 = vpop.eup %1403 }
 0xa3e   :  { %543 = vrot.lane.b32.xlu0 %v1404_v23, %s1455_s3 }
 0xab0   :  { %v544_v42 = vpop.permute.xlu0 %543 }
 0xab1   :  { %v546_v43 = vmul.f32 %v544_v42, %v526_v35 }
 0xab3   :  { %v548_v44 = vrot.slane %v546_v43, 6  ;;  %v1619_v45 = vsel %vm963_vm7, %v962_v25, %v546_v43 }
 0xab5   :  { %549 = vrot.lane.b32.xlu1 %v548_v44, %s1456_s12 }
 0xb27   :  { %v550_v46 = vpop.permute.xlu1 %549 }
 0xb28   :  { %1274 = vmatmul.mubr.msk.f32.vlgmr.msra.gmra.mrb[4].mxu1 %vm132_vm4, %v550_v46 }
 0xb29   :  { %1362 = vmatpush3.bf16.msra.mxu1 %v1511_v7  ;;  %1295 = vmatprep.mubr.msk.f32.mxu1 %vm1452_vm1, %v1453_v10 }
 0xb2a   :  { %1363 = vmatprep.subr.bf16.mxu1 %v1451_v3 }
 0xb2d   :  { %1365 = vmatpush3.bf16.msra.mxu1 %v1526_v12 }
 0xbfb   :  { %v619_v47 = vpop.f32.mrb[4].mxu1 }
 0xbfc   :  { %v623_v48 = vadd.f32 %v619_v47, %v1550_v21  ;;  %v1275_v49 = vpop.f32.mrb[5].mxu1 }
 0xbfe   :  { %v624_v50 = vmul.f32 %v623_v48, %v1554_v24 }
 0xc00   :  { %1405 = vtanh.f32 %v624_v50 }
 0xc0a   :  { %v1406_v51 = vpop.eup %1405 }
 0xc0b   :  { %v626_v52 = vmul.f32 %v1406_v51, %v1554_v24 }
 0xc0d   :  { %v627_v53 = vadd.f32 %v626_v52, %v1560_v31 }
 0xc0f   :  { %633 = vrot.lane.b32.xlu0 %v627_v53, %s1455_s3  ;;  %v631_v57 = vmul.f32 %v629_v56, %v627_v53 }
 0xc81   :  { %v634_v54 = vpop.permute.xlu0 %633 }
 0xc82   :  { %v636_v55 = vmul.f32 %v634_v54, %v627_v53 }
 0xc84   :  { %638 = vrot.lane.b32.xlu1 %v636_v55, %s1456_s12 }
 0xcf6   :  { %v639_v58 = vpop.permute.xlu1 %638 }
 0xcf7   :  { %v641_v59 = vadd.f32 %v639_v58, %v631_v57  ;;  %v123_v58 = vld [vmem:[%s1712_s4 + $0x10] sm:$0xff] }
 0xcf9   :  { %1407 = vtanh.f32 %v641_v59 }
 0xd03   :  { %v1408_v60 = vpop.eup %1407 }
 0xd04   :  { %644 = vrot.lane.b32.xlu0 %v1408_v60, %s1455_s3 }
 0xd76   :  { %v645_v61 = vpop.permute.xlu0 %644 }
 0xd77   :  { %v647_v62 = vmul.f32 %v645_v61, %v627_v53 }
 0xd79   :  { %649 = vrot.lane.b32.xlu1 %v647_v62, %s1456_s12 }
 0xdeb   :  { %v650_v63 = vpop.permute.xlu1 %649 }
 0xdec   :  { %1285 = vmatmul.mubr.msk.f32.vlgmr.msra.gmra.mrb[6].mxu0 %vm132_vm4, %v650_v63 }
 0xded   :  { %1368 = vmatpush3.bf16.msra.mxu0 %v1511_v7  ;;  %1306 = vmatprep.mubr.msk.f32.mxu0 %vm1452_vm1, %v1453_v10 }
 0xdee   :  { %1369 = vmatprep.subr.bf16.mxu0 %v1451_v3  ;;  %v732_v3 = vrot.slane %v641_v59, 6  ;;  %v124_v59 = vld [vmem:[%s1712_s4 + $0x18] sm:$0xff] }
 0xdef   :  { %v1376_v60 = vpack.c.bf16 %v124_v59, %v123_v58 }
 0xdf1   :  { %1371 = vmatpush3.bf16.msra.mxu0 %v1526_v12 }
 0xebf   :  { %v719_v0 = vpop.f32.mrb[6].mxu0 }
 0xec0   :  { %v724_v1 = vrot.slane %v719_v0, 6  ;;  %v1286_v2 = vpop.f32.mrb[7].mxu0 }
 0xec1   :  { %v1161_v2 = vld [vmem:[%s1713_s5] ss:$0 sm:$0xff] }
 0xec2   :  { %v726_v4 = vadd.f32 %v724_v1, %v1550_v21 }
 0xec4   :  { %v727_v5 = vmul.f32 %v726_v4, %v1554_v24 }
 0xec6   :  { %1409 = vtanh.f32 %v727_v5 }
 0xed0   :  { %v1410_v6 = vpop.eup %1409 }
 0xed1   :  { %v729_v8 = vmul.f32 %v1410_v6, %v1554_v24 }
 0xed3   :  { %v730_v7 = vadd.f32 %v729_v8, %v1560_v31 }
 0xed5   :  { %736 = vrot.lane.b32.xlu0 %v730_v7, %s1455_s3  ;;  %v734_v12 = vmul.f32 %v732_v3, %v730_v7 }
 0xf47   :  { %v737_v10 = vpop.permute.xlu0 %736 }
 0xf48   :  { %v739_v9 = vmul.f32 %v737_v10, %v730_v7 }
 0xf4a   :  { %741 = vrot.lane.b32.xlu1 %v739_v9, %s1456_s12 }
 0xfbc   :  { %v742_v11 = vpop.permute.xlu1 %741 }
 0xfbd   :  { %v744_v13 = vadd.f32 %v742_v11, %v734_v12 }
 0xfbf   :  { %1411 = vtanh.f32 %v744_v13  ;;  %v836_v33 = vrot.slane %v744_v13, 6 }
 0xfc9   :  { %v1412_v14 = vpop.eup %1411 }
 0xfca   :  { %747 = vrot.lane.b32.xlu0 %v1412_v14, %s1455_s3 }
0x103c   :  { %v748_v15 = vpop.permute.xlu0 %747 }
0x103d   :  { %v750_v16 = vmul.f32 %v748_v15, %v730_v7 }
0x103f   :  { %v752_v17 = vrot.slane %v750_v16, 2  ;;  %v965_v40 = vsel %vm959_vm5, %v647_v62, %v750_v16 }
0x1041   :  { %753 = vrot.lane.b32.xlu1 %v752_v17, %s1456_s12 }
0x10b3   :  { %v754_v18 = vpop.permute.xlu1 %753 }
0x10b4   :  { %1296 = vmatmul.mubr.msk.f32.vlgmr.msra.gmra.mrb[6].mxu1 %vm132_vm4, %v754_v18 }
0x1187   :  { %v823_v19 = vpop.f32.mrb[6].mxu1 }
0x1188   :  { %v828_v20 = vrot.slane %v823_v19, 4  ;;  %v1297_v22 = vpop.f32.mrb[7].mxu1 }
0x118a   :  { %v830_v25 = vadd.f32 %v828_v20, %v1550_v21 }
0x118c   :  { %v831_v26 = vmul.f32 %v830_v25, %v1554_v24 }
0x118e   :  { %1413 = vtanh.f32 %v831_v26 }
0x1198   :  { %v1414_v27 = vpop.eup %1413 }
0x1199   :  { %v833_v28 = vmul.f32 %v1414_v27, %v1554_v24 }
0x119b   :  { %v834_v29 = vadd.f32 %v833_v28, %v1560_v31 }
0x119d   :  { %840 = vrot.lane.b32.xlu0 %v834_v29, %s1455_s3  ;;  %v838_v34 = vmul.f32 %v836_v33, %v834_v29 }
0x120f   :  { %v841_v30 = vpop.permute.xlu0 %840 }
0x1210   :  { %v843_v32 = vmul.f32 %v841_v30, %v834_v29 }
0x1212   :  { %845 = vrot.lane.b32.xlu1 %v843_v32, %s1456_s12 }
0x1284   :  { %v846_v35 = vpop.permute.xlu1 %845 }
0x1285   :  { %v848_v36 = vadd.f32 %v846_v35, %v838_v34 }
0x1287   :  { %1415 = vtanh.f32 %v848_v36  ;;  %v940_v54 = vrot.slane %v848_v36, 6 }
0x1291   :  { %v1416_v37 = vpop.eup %1415 }
0x1292   :  { %851 = vrot.lane.b32.xlu0 %v1416_v37, %s1455_s3 }
0x1304   :  { %v852_v38 = vpop.permute.xlu0 %851 }
0x1305   :  { %v854_v39 = vmul.f32 %v852_v38, %v834_v29 }
0x1307   :  { %v856_v41 = vrot.slane %v854_v39, 4  ;;  %v966_v23 = vsel %vm961_vm6, %v965_v40, %v854_v39 }
0x1309   :  { %857 = vrot.lane.b32.xlu1 %v856_v41, %s1456_s12 }
0x137b   :  { %v858_v42 = vpop.permute.xlu1 %857 }
0x137c   :  { %1307 = vmatmul.mubr.msk.f32.vlgmr.msra.gmra.mrb[8].mxu0 %vm132_vm4, %v858_v42 }
0x144f   :  { %v927_v43 = vpop.f32.mrb[8].mxu0 }
0x1450   :  { %v932_v44 = vrot.slane %v927_v43, 2  ;;  %v1308_v46 = vpop.f32.mrb[9].mxu0 }
0x1452   :  { %v934_v47 = vadd.f32 %v932_v44, %v1550_v21 }
0x1454   :  { %v935_v48 = vmul.f32 %v934_v47, %v1554_v24 }
0x1456   :  { %1417 = vtanh.f32 %v935_v48 }
0x1460   :  { %v1418_v49 = vpop.eup %1417 }
0x1461   :  { %v937_v50 = vmul.f32 %v1418_v49, %v1554_v24  ;;  %v121_v24 = vld [vmem:[%s1712_s4] sm:$0xff] }
0x1463   :  { %v938_v51 = vadd.f32 %v937_v50, %v1560_v31  ;;  %v122_v31 = vld [vmem:[%s1712_s4 + $0x8] sm:$0xff]  ;;  %s1457_s4 = smov [#allocation2]  }
0x1464   :  { %s1140_s5 = sshll.u32 %s1457_s4, 4  ;;  %s1141_s5 = int_to_ptr.vmem [resolvable:$true] %s1140_s5 }
0x1465   :  { %944 = vrot.lane.b32.xlu0 %v938_v51, %s1455_s3  ;;  %v942_v55 = vmul.f32 %v940_v54, %v938_v51  ;;  %s1427_s23 = scalar_lea.vmem %s1141_s5, 256  ;;  %p1432_p1 = scmp.lt.s32.totalorder %s1141_s5, %s1141_s5 }
0x1466   :  { %p1428_p0 = scmp.ne.s32.totalorder %s1141_s5, %s1427_s23  ;;  %p1433_p2 = scmp.lt.s32.totalorder %s1427_s23, %s1427_s23 }
0x1468   :  { %p1434_p3 = por %p1433_p2, %p1432_p1 }
0x146a   :  { %p1435_p4 = pnand %p1434_p3, %p1428_p0 }
0x14d7   :  { %v945_v52 = vpop.permute.xlu0 %944 }
0x14d8   :  { %v947_v53 = vmul.f32 %v945_v52, %v938_v51 }
0x14da   :  { %949 = vrot.lane.b32.xlu1 %v947_v53, %s1456_s12 }
0x14de   :  { %976 = vrot.lane.b32.xlu1 %v1619_v45, %s1456_s12  ;;  %v1372_v45 = vpack.c.bf16 %v122_v31, %v121_v24 }
0x14e0   :  { %1373 = vmatprep.subr.bf16.mxu1 %v1372_v45 }
0x14e1   :  { %1375 = vmatpush3.bf16.msra.mxu1 %v1372_v45 }
0x14e2   :  { %1377 = vmatprep.subr.bf16.mxu1 %v1376_v60 }
0x14e5   :  { %1379 = vmatpush3.bf16.msra.mxu1 %v1376_v60 }
0x154c   :  { %v950_v21 = vpop.permute.xlu1 %949 }
0x154d   :  { %v952_v56 = vadd.f32 %v950_v21, %v942_v55 }
0x154f   :  { %1419 = vtanh.f32 %v952_v56 }
0x1550   :  { %v977_v57 = vpop.permute.xlu1 %976 }
0x1551   :  { %1317 = vmatprep.mubr.msk.f32.mxu1 %vm132_vm4, %v977_v57 }
0x1559   :  { %v1420_v61 = vpop.eup %1419 }
0x155a   :  { %955 = vrot.lane.b32.xlu0 %v1420_v61, %s1455_s3 }
0x15cc   :  { %v956_v62 = vpop.permute.xlu0 %955 }
0x15cd   :  { %v958_v63 = vmul.f32 %v956_v62, %v938_v51 }
0x15cf   :  { %v967_v0 = vsel %vm963_vm7, %v966_v23, %v958_v63 }
0x15d0   :  { %978 = vrot.lane.b32.xlu0 %v967_v0, %s1456_s12 }
0x1642   :  { %v979_v1 = vpop.permute.xlu0 %978 }
0x1643   :  { %1318 = vmatmul.mubr.msk.f32.vlgmr.msra.gmra.mrb[8].mxu1 %vm132_vm4, %v979_v1 }
0x1716   :  { %v1319_v4 = vpop.f32.mrb[8].mxu1 }
0x1717   :  { %v1050_v5 = vpop.f32.mrb[9].mxu1  ;;  %v1056_v9 = vadd.f32 %v1319_v4, %v1161_v2 }
0x1718   :  { %v1051_v6 = vadd.f32 %v1161_v2, %v1050_v5 }
0x1719   :  { %v1071_v13 = vrot.slane %v1056_v9, 2  ;;  %v1074_v15 = vrot.slane %v1056_v9, 4  ;;  %v1077_v17 = vrot.slane %v1056_v9, 6 }
0x171a   :  { %v1060_v8 = vrot.slane %v1051_v6, 2  ;;  %v1063_v10 = vrot.slane %v1051_v6, 4  ;;  %v1066_v12 = vrot.slane %v1051_v6, 6 }
0x171c   :  { %v1062_v7 = vmax.f32 %v1051_v6, %v1060_v8 }
0x171e   :  { %v1065_v3 = vmax.f32 %v1062_v7, %v1063_v10 }
0x1720   :  { %v1068_v11 = vmax.f32 %v1065_v3, %v1066_v12 }
0x1722   :  { %v1069_v14 = vmax.f32 %v1068_v11, %v1056_v9 }
0x1724   :  { %v1073_v16 = vmax.f32 %v1069_v14, %v1071_v13 }
0x1726   :  { %v1076_v18 = vmax.f32 %v1073_v16, %v1074_v15 }
0x1728   :  { %v1079_v19 = vmax.f32 %v1076_v18, %v1077_v17 }
0x172a   :  { %v1081_v20 = vrot.slane %v1079_v19, 6  ;;  %v1083_v22 = vrot.slane %v1079_v19, 4  ;;  %v1085_v25 = vrot.slane %v1079_v19, 2 }
0x172c   :  { %v1087_v26 = vsel %vm959_vm5, %v1079_v19, %v1081_v20 }
0x172d   :  { %v1088_v27 = vsel %vm961_vm6, %v1087_v26, %v1083_v22 }
0x172e   :  { %v1089_v28 = vsel %vm963_vm7, %v1088_v27, %v1085_v25 }
0x172f   :  { %v1090_v29 = vsub.f32 %v1051_v6, %v1089_v28  ;;  %v1091_v30 = vsub.f32 %v1056_v9, %v1089_v28 }
0x1731   :  { %v1092_v32 = vmul.f32 1.442695, %v1090_v29  ;;  %v1094_v33 = vmul.f32 1.442695, %v1091_v30 }
0x1733   :  { %1421 = vpow2.f32 %v1092_v32 }
0x1734   :  { %1423 = vpow2.f32 %v1094_v33 }
0x173d   :  { %v1422_v34 = vpop.eup %1421 }
0x173e   :  { %v1097_v35 = vrot.slane %v1422_v34, 2  ;;  %v1100_v37 = vrot.slane %v1422_v34, 4  ;;  %v1103_v39 = vrot.slane %v1422_v34, 6  ;;  %v1424_v40 = vpop.eup %1423 }
0x173f   :  { %v1108_v42 = vrot.slane %v1424_v40, 2  ;;  %v1111_v44 = vrot.slane %v1424_v40, 4  ;;  %v1114_v47 = vrot.slane %v1424_v40, 6 }
0x1740   :  { %v1099_v36 = vadd.f32 %v1422_v34, %v1097_v35 }
0x1742   :  { %v1102_v38 = vadd.f32 %v1100_v37, %v1099_v36 }
0x1744   :  { %v1105_v41 = vadd.f32 %v1103_v39, %v1102_v38 }
0x1746   :  { %v1106_v23 = vadd.f32 %v1424_v40, %v1105_v41 }
0x1748   :  { %v1110_v43 = vadd.f32 %v1108_v42, %v1106_v23 }
0x174a   :  { %v1113_v46 = vadd.f32 %v1111_v44, %v1110_v43 }
0x174c   :  { %v1116_v48 = vadd.f32 %v1114_v47, %v1113_v46 }
0x174e   :  { %1425 = vrcp.f32 %v1116_v48 }
0x1758   :  { %v1426_v49 = vpop.eup %1425 }
0x1759   :  { %v1118_v50 = vmul.f32 %v1426_v49, %v1116_v48 }
0x175b   :  { %v1119_v51 = vsub.f32 2.0, %v1118_v50 }
0x175d   :  { %v1120_v52 = vmul.f32 %v1426_v49, %v1119_v51 }
0x175f   :  { %v1122_v53 = vrot.slane %v1120_v52, 6  ;;  %v1124_v54 = vrot.slane %v1120_v52, 4  ;;  %v1126_v55 = vrot.slane %v1120_v52, 2 }
0x1761   :  { %v1128_v21 = vsel %vm959_vm5, %v1120_v52, %v1122_v53 }
0x1762   :  { %v1129_v56 = vsel %vm961_vm6, %v1128_v21, %v1124_v54 }
0x1763   :  { %v1130_v57 = vsel %vm963_vm7, %v1129_v56, %v1126_v55 }
0x1764   :  { %v1131_v24 = vmul.f32 %v1422_v34, %v1130_v57  ;;  %v1132_v31 = vmul.f32 %v1424_v40, %v1130_v57 }
0x1766   :  { %1133 = vst [vmem:[#allocation2] sm:$0xff] %v1131_v24  ;;  %1134 = vst [vmem:[#allocation2 + $0x8] sm:$0xff] %v1132_v31 }
0x1767   :  { %1438 = shalt.err (!%p1435_p4)
}
0x1768   :  { %s1439_s26 = scalar_lea.hbm %s1714_s6, 256 }
0x1769   :  { %p1440_p5 = scmp.ne.s32.totalorder %s1714_s6, %s1439_s26  ;;  %p1443_p6 = scmp.lt.u32.totalorder %s1439_s26, %s1714_s6 }
0x176b   :  { %p1445_p7 = pnand %p1443_p6, %p1440_p5 }
0x176d   :  { %1448 = shalt.err (!%p1445_p7)
}
0x176e   :  { %s1458_s1 = smov 128   ;;  %s1459_s7 = smov 8  }
0x176f   :  { %1146 = dma.vmem_to_hbm [thread:$0]  %s1141_s5, 256, %s1714_s6, [#allocation3], %s1458_s1, %s1458_s1, %s1459_s7  }
0x1770   :  { %1449 = dma.done.wait [#allocation3], 256  }
0x1771   :  { %1450 = vsyncadd [#allocation3], 4294967040 }
0x1772   :  { %1150 = vsyncpa [#allocation3], 1 }

</bundles_post_ra>
